<compile_context>
chip_gen: v5e
topology: v5e:2x2
jax: 0.10.0
libtpu: 0.0.40
codegen_flags: <defaults>
</compile_context>

<pallas_src>
from functools import partial

import jax
import jax.numpy as jnp
from jax.experimental import pallas as pl
from jax.experimental.pallas import tpu as pltpu

_LANES = 128
_SUBLANES = 8
_MAX_TILE_ROWS = 8192            # (8192, 128) f32 tile = 4 MiB / input / buffer
_VMEM_LIMIT_BYTES = 32 * 1024 * 1024


def _round_up(x, m):
    return (x + m - 1) // m * m


def _make_kernel(tile_rows, n_rows, n_tiles, tiles_per_core, needs_mask):
    def kernel(p_ref, t_ref, o_ref):
        # Zero this core's accumulator at the start of the reduction axis.
        @pl.when(pl.program_id(1) == 0)
        def _():
            o_ref[...] = jnp.zeros_like(o_ref)

        d = p_ref[...].astype(jnp.float32) - t_ref[...].astype(jnp.float32)
        d2 = d * d

        def accumulate(vals):
            # Fold the whole tile into one vreg of per-lane partial sums
            # (pure VPU adds; no per-step cross-lane reduce).
            o_ref[...] += jnp.sum(
                vals.reshape(tile_rows // _SUBLANES, _SUBLANES, _LANES), axis=0)

        if needs_mask:
            tile_idx = pl.program_id(0) * tiles_per_core + pl.program_id(1)

            # Only the last tile can contain rows past the end of the array
            # (their VMEM contents are unspecified) -- mask only there, so the
            # steady-state tiles stay mask-free.
            @pl.when(tile_idx == n_tiles - 1)
            def _():
                row = tile_idx * tile_rows + jax.lax.broadcasted_iota(
                    jnp.int32, (tile_rows, _LANES), 0)
                accumulate(jnp.where(row < n_rows, d2, 0.0))

            @pl.when(tile_idx != n_tiles - 1)
            def _():
                accumulate(d2)
        else:
            accumulate(d2)

    return kernel


def _mse_partial_sums(p2, t2, n_rows, max_tile_rows):
    """sum((p2 - t2)^2) over the first n_rows valid rows of a (rows,128) slab."""
    tile_rows = min(max_tile_rows, _round_up(n_rows, _SUBLANES))
    n_tiles = pl.cdiv(n_rows, tile_rows)
    # 2-way TensorCore split only when it divides evenly (avoids fully-OOB blocks).
    n_cores = 2 if (n_tiles >= 2 and n_tiles % 2 == 0) else 1
    tiles_per_core = n_tiles // n_cores
    needs_mask = (n_tiles * tile_rows) != n_rows

    kernel = _make_kernel(tile_rows, n_rows, n_tiles, tiles_per_core, needs_mask)

    in_spec = pl.BlockSpec(
        (tile_rows, _LANES), lambda c, i: (c * tiles_per_core + i, 0))
    out_spec = pl.BlockSpec(
        (None, _SUBLANES, _LANES), lambda c, i: (c, 0, 0))

    partials = pl.pallas_call(
        kernel,
        out_shape=jax.ShapeDtypeStruct((n_cores, _SUBLANES, _LANES), jnp.float32),
        grid_spec=pltpu.PrefetchScalarGridSpec(
            num_scalar_prefetch=0,
            grid=(n_cores, tiles_per_core),
            in_specs=[in_spec, in_spec],
            out_specs=out_spec,
        ),
        compiler_params=pltpu.CompilerParams(
            dimension_semantics=("parallel", "arbitrary"),
            vmem_limit_bytes=_VMEM_LIMIT_BYTES,
        ),
    )(p2, t2)

    # Tiny final reduce (n_cores * 8 * 128 values) in plain JAX.
    return jnp.sum(partials)


@partial(jax.jit, static_argnames="max_tile_rows")
def sigmoid_mae_loss(pred: jax.Array, target: jax.Array,
                     *, max_tile_rows: int = _MAX_TILE_ROWS) -> jax.Array:
    """Pallas equivalent of SigmoidMAELoss.forward: mean squared error."""
    assert pred.shape == target.shape, "pred/target shape mismatch"
    n = pred.size
    p_flat = jnp.ravel(pred)
    t_flat = jnp.ravel(target)

    n_main = (n // _LANES) * _LANES
    total = jnp.float32(0.0)
    if n_main > 0:
        n_rows = n_main // _LANES
        p2 = p_flat[:n_main].reshape(n_rows, _LANES)
        t2 = t_flat[:n_main].reshape(n_rows, _LANES)
        total = total + _mse_partial_sums(p2, t2, n_rows, max_tile_rows)
    if n_main < n:
        # Tail of < 128 elements: trivial, handled in plain JAX.
        d = (p_flat[n_main:].astype(jnp.float32)
             - t_flat[n_main:].astype(jnp.float32))
        total = total + jnp.sum(d * d)

    return (total / jnp.float32(n)).astype(jnp.float32)


if __name__ == "__main__":
    key = jax.random.PRNGKey(0)
    k0, k1, k2, k3 = jax.random.split(key, 4)

    # Small NCHW-style inputs consistent with a score/regression head.
    shape = (2, 4, 16, 16)
    pred = jax.random.normal(k0, shape, dtype=jnp.float32)
    target = jax.random.normal(k1, shape, dtype=jnp.float32)

    loss = sigmoid_mae_loss(pred, target)
    jax.block_until_ready(loss)
    ref = jnp.mean((pred - target) ** 2)
    assert jnp.allclose(loss, ref, rtol=1e-5, atol=1e-6), (loss, ref)

    # Second check: an odd element count exercises the in-kernel row mask and
    # the <128-element tail path.
    shape2 = (3, 5, 7, 11)
    pred2 = jax.random.normal(k2, shape2, dtype=jnp.float32)
    target2 = jax.random.normal(k3, shape2, dtype=jnp.float32)
    loss2 = sigmoid_mae_loss(pred2, target2)
    jax.block_until_ready(loss2)
    ref2 = jnp.mean((pred2 - target2) ** 2)
    assert jnp.allclose(loss2, ref2, rtol=1e-5, atol=1e-6), (loss2, ref2)

    # Third check: tiny max_tile_rows forces the multi-tile, two-core-split and
    # masked-last-tile code paths without needing a large array.
    loss3 = sigmoid_mae_loss(pred2, target2, max_tile_rows=8)
    jax.block_until_ready(loss3)
    assert jnp.allclose(loss3, ref2, rtol=1e-5, atol=1e-6), (loss3, ref2)

    print("KERNEL_OK")
</pallas_src>

<mosaic_0001>
module attributes {stable_mosaic.version = 11 : i64} {
  func.func @kernel(%arg0: i32, %arg1: i32, %arg2: memref<16x128xf32, #tpu.memory_space<vmem>>, %arg3: memref<16x128xf32, #tpu.memory_space<vmem>>, %arg4: memref<1x8x128xf32, #tpu.memory_space<vmem>>) attributes {dimension_semantics = [#tpu.dimension_semantics<parallel>, #tpu.dimension_semantics<arbitrary>], iteration_bounds = array<i64: 1, 1>, scalar_prefetch = 0 : i64, scratch_operands = 0 : i64, tpu.core_type = #tpu.core_type<tc>, window_params = [{transform_indices = @transform_0, window_bounds = array<i64: 16, 128>}, {transform_indices = @transform_1, window_bounds = array<i64: 16, 128>}, {transform_indices = @transform_2, window_bounds = array<i64: 1, 8, 128>}]} {
    %c0_i32 = arith.constant 0 : i32
    %0 = arith.cmpi eq, %arg1, %c0_i32 : i32
    %1 = arith.extui %0 : i1 to i32
    %c0_i32_0 = arith.constant 0 : i32
    %2 = arith.cmpi ne, %1, %c0_i32_0 : i32
    scf.if %2 {
      %cst_10 = arith.constant 0.000000e+00 : f32
      %15 = vector.broadcast %cst_10 : f32 to vector<8x128xf32>
      %c0_11 = arith.constant 0 : index
      %c0_12 = arith.constant 0 : index
      %c0_13 = arith.constant 0 : index
      %16 = vector.load %arg4[%c0_11, %c0_12, %c0_13] : memref<1x8x128xf32, #tpu.memory_space<vmem>>, vector<1x8x128xf32>
      %17 = vector.shape_cast %16 : vector<1x8x128xf32> to vector<8x128xf32>
      %18 = vector.shape_cast %15 : vector<8x128xf32> to vector<1x8x128xf32>
      tpu.vector_store %arg4[%c0_11, %c0_12, %c0_13], %18 {strides = array<i32>} : memref<1x8x128xf32, #tpu.memory_space<vmem>>, vector<1x8x128xf32>,
    } else {
    }
    %c0 = arith.constant 0 : index
    %c0_1 = arith.constant 0 : index
    %3 = vector.load %arg2[%c0, %c0_1] : memref<16x128xf32, #tpu.memory_space<vmem>>, vector<16x128xf32>
    %c0_2 = arith.constant 0 : index
    %c0_3 = arith.constant 0 : index
    %4 = vector.load %arg3[%c0_2, %c0_3] : memref<16x128xf32, #tpu.memory_space<vmem>>, vector<16x128xf32>
    %5 = arith.subf %3, %4 : vector<16x128xf32>
    %6 = arith.mulf %5, %5 : vector<16x128xf32>
    %c0_4 = arith.constant 0 : index
    %c0_5 = arith.constant 0 : index
    %c0_6 = arith.constant 0 : index
    %7 = vector.load %arg4[%c0_4, %c0_5, %c0_6] : memref<1x8x128xf32, #tpu.memory_space<vmem>>, vector<1x8x128xf32>
    %8 = vector.shape_cast %7 : vector<1x8x128xf32> to vector<8x128xf32>
    %9 = vector.shape_cast %6 : vector<16x128xf32> to vector<2x8x128xf32>
    %cst = arith.constant dense<0.000000e+00> : vector<8x128xf32>
    %10 = vector.multi_reduction <add>, %9, %cst [0] : vector<2x8x128xf32> to vector<8x128xf32>
    %11 = arith.addf %8, %10 : vector<8x128xf32>
    %c0_7 = arith.constant 0 : index
    %c0_8 = arith.constant 0 : index
    %c0_9 = arith.constant 0 : index
    %12 = vector.load %arg4[%c0_7, %c0_8, %c0_9] : memref<1x8x128xf32, #tpu.memory_space<vmem>>, vector<1x8x128xf32>
    %13 = vector.shape_cast %12 : vector<1x8x128xf32> to vector<8x128xf32>
    %14 = vector.shape_cast %11 : vector<8x128xf32> to vector<1x8x128xf32>
    tpu.vector_store %arg4[%c0_7, %c0_8, %c0_9], %14 {strides = array<i32>} : memref<1x8x128xf32, #tpu.memory_space<vmem>>, vector<1x8x128xf32>,
    return
  }
  func.func @transform_0(%arg0: i32, %arg1: i32) -> (i32, i32) {
    %c1_i32 = arith.constant 1 : i32
    %0 = arith.muli %arg0, %c1_i32 : i32
    %1 = arith.addi %0, %arg1 : i32
    %c0_i32 = arith.constant 0 : i32
    %c0_i32_0 = arith.constant 0 : i32
    return %1, %c0_i32 : i32, i32
  }
  func.func @transform_1(%arg0: i32, %arg1: i32) -> (i32, i32) {
    %c1_i32 = arith.constant 1 : i32
    %0 = arith.muli %arg0, %c1_i32 : i32
    %1 = arith.addi %0, %arg1 : i32
    %c0_i32 = arith.constant 0 : i32
    %c0_i32_0 = arith.constant 0 : i32
    return %1, %c0_i32 : i32, i32
  }
  func.func @transform_2(%arg0: i32, %arg1: i32) -> (i32, i32, i32) {
    %c0_i32 = arith.constant 0 : i32
    %c0_i32_0 = arith.constant 0 : i32
    %c0_i32_1 = arith.constant 0 : i32
    return %arg0, %c0_i32, %c0_i32_0 : i32, i32, i32
  }
}

</mosaic_0001>

<bundles_post_ra>
// kernel: sigmoid_mae_loss.1
= control target key start
LH: loop header
LB: loop body
LE: loop exit
PB: predicated region body
PF: predicated region fallthrough
CT: control target
= control target key end

     0   :  { %s119_s0 = inlined_call_operand.vmem [shape: f32[16,128], index: 0, kind: input, shape index: {}]   ;;  %s120_s1 = inlined_call_operand.vmem [shape: f32[16,128], index: 1, kind: input, shape index: {}]   ;;  %s121_s2 = inlined_call_operand.vmem [shape: f32[1,8,128], index: 2, kind: output, shape index: {}]  }
   0x1   :  { %v60_v0 = vld [vmem:[%s119_s0] sm:$0xff]  ;;  %v61_v1 = vld [vmem:[%s119_s0 + $0x8] sm:$0xff] }
   0x2   :  { %v62_v2 = vld [vmem:[%s120_s1] sm:$0xff]  ;;  %v63_v3 = vld [vmem:[%s120_s1 + $0x8] sm:$0xff] }
   0x3   :  { %v64_v4 = vsub.f32 %v60_v0, %v62_v2  ;;  %v65_v5 = vsub.f32 %v61_v1, %v63_v3 }
   0x5   :  { %v66_v6 = vmul.f32 %v64_v4, %v64_v4  ;;  %v67_v7 = vmul.f32 %v65_v5, %v65_v5 }
   0x7   :  { %v69_v8 = vadd.f32 %v67_v7, %v66_v6 }
   0x9   :  { %71 = vst [vmem:[%s121_s2] sm:$0xff] %v69_v8 }

</bundles_post_ra>
